<compile_context>
chip_gen: v6e
topology: v6e:2x2x1
jax: 0.10.0
libtpu: 0.0.40
codegen_flags: <defaults>
</compile_context>

<pallas_src>
import functools
import math

import jax
import jax.numpy as jnp
from jax import lax
from jax.experimental import pallas as pl
from jax.experimental.pallas import tpu as pltpu

LN_EPS = 1e-5              # PyTorch nn.LayerNorm default eps
NEG_INF = -1e30            # finite mask sentinel (avoids -inf arithmetic)
_GELU_C = math.sqrt(2.0 / math.pi)


def _layernorm(x, gamma, beta):
    mean = jnp.mean(x, axis=-1, keepdims=True)
    var = jnp.mean((x - mean) ** 2, axis=-1, keepdims=True)
    return (x - mean) * lax.rsqrt(var + LN_EPS) * gamma + beta


def _vmem_limit_bytes():
    """Explicit VMEM budget: ~3/4 of the chip's capacity (64 MiB v7x, 128 MiB v5e/v6e)."""
    cap = 64 * 1024 * 1024
    try:
        cap = int(pltpu.get_tpu_info().vmem_capacity_bytes)
    except Exception:
        pass
    return int(cap * 3 // 4)


def _pick_tile(dim, target, quantum):
    """Largest multiple of `quantum` <= target that divides `dim` (else the full dim)."""
    if dim <= target:
        return dim
    t = (target // quantum) * quantum
    while t >= quantum:
        if dim % t == 0:
            return t
        t -= quantum
    return dim


# ------------- Kernel A: LayerNorm1 + fused QKV projection (tiled) -------------
def ln_qkv_kernel(x_ref, g_ref, b_ref, w_ref, o_ref, *, compute_dtype):
    # x_ref: (1, tS, H) f32; w_ref: (H, tN) compute_dtype; o_ref: (1, tS, tN)
    ln = _layernorm(x_ref[0], g_ref[...], b_ref[...])          # f32 elementwise
    o_ref[0] = jnp.dot(ln.astype(compute_dtype), w_ref[...],
                       preferred_element_type=jnp.float32).astype(o_ref.dtype)


# ---- Kernel B: fused causal attention + out-proj + residual + LN2 + GELU MLP ---
# One grid step handles one (batch, chunk) pair, where "chunk" n is head n of the
# module's flat .view(B, nheads, S, H):  q/k/v of head n are exactly the
# (Sg, nheads*H) row-chunk of qkv, read column-wise interleaved.
def attn_proj_mlp_kernel(qkv_ref, x_ref, g2_ref, b2_ref, wp_ref, w1_ref, w2_ref,
                         o_ref, qblk, kblk, vblk, fblk,
                         *, nheads, hdim, compute_dtype, approx_recip):
    Sg = qkv_ref.shape[1]
    NH = nheads * hdim
    S = Sg * nheads
    cd = compute_dtype
    scale = 1.0 / math.sqrt(hdim)

    # De-interleave the flat-view chunk into "blocked" (S, hdim) scratches.
    # blocked row i = r*Sg + a  <->  sequence position s = a*nheads + r.
    for r in range(nheads):                       # static python loop (unrolled)
        lo = r * hdim
        qblk[r * Sg:(r + 1) * Sg, :] = qkv_ref[0, :, lo:lo + hdim].astype(jnp.float32)
        kblk[r * Sg:(r + 1) * Sg, :] = qkv_ref[0, :, NH + lo:NH + lo + hdim].astype(jnp.float32)
        vblk[r * Sg:(r + 1) * Sg, :] = qkv_ref[0, :, 2 * NH + lo:2 * NH + lo + hdim].astype(jnp.float32)

    q = qblk[...].astype(cd)
    k = kblk[...].astype(cd)
    v = vblk[...].astype(cd)

    # Scores contracting the head dims directly (no transposed copy of k).
    s_mat = lax.dot_general(q, k, (((1,), (1,)), ((), ())),
                            preferred_element_type=jnp.float32) * scale   # (S, S)

    # Causal mask in blocked index order (finite sentinel, keep where t <= s).
    i_idx = lax.broadcasted_iota(jnp.int32, (S, S), 0)
    j_idx = lax.broadcasted_iota(jnp.int32, (S, S), 1)
    s_pos = (i_idx % Sg) * nheads + i_idx // Sg
    t_pos = (j_idx % Sg) * nheads + j_idx // Sg
    s_mat = jnp.where(t_pos <= s_pos, s_mat, NEG_INF)

    # Numerically-stable softmax; the divide becomes an EUP reciprocal + multiply.
    m = jnp.max(s_mat, axis=-1, keepdims=True)
    e = jnp.exp(s_mat - m)
    denom = jnp.sum(e, axis=-1, keepdims=True)
    p = e * pl.reciprocal(denom, approx=approx_recip)

    out_blk = jnp.dot(p.astype(cd), v, preferred_element_type=jnp.float32)  # (S, hdim)

    # Re-interleave into the flat-view (Sg, NH) tile: F[:, r*H:(r+1)*H] = out_blk rows of r.
    for r in range(nheads):
        fblk[:, r * hdim:(r + 1) * hdim] = out_blk[r * Sg:(r + 1) * Sg, :]

    # Out-projection + residual + LN2 + GELU MLP, all on the same Sg rows.
    proj = jnp.dot(fblk[...].astype(cd), wp_ref[...],
                   preferred_element_type=jnp.float32)                      # (Sg, H)
    y = _layernorm(x_ref[0] + proj, g2_ref[...], b2_ref[...])               # f32
    h = jnp.dot(y.astype(cd), w1_ref[...], preferred_element_type=jnp.float32)
    g = 0.5 * h * (1.0 + jnp.tanh(_GELU_C * (h + 0.044715 * h * h * h)))    # NewGELU
    o_ref[0] = jnp.dot(g.astype(cd), w2_ref[...],
                       preferred_element_type=jnp.float32).astype(o_ref.dtype)


# --------------------------------- wrapper -------------------------------------
def att_block_forward(x, params, nheads, *, compute_dtype=jnp.float32):
    B, S, H = x.shape
    NH = nheads * H
    QKV = 3 * NH
    assert S % nheads == 0, "flat-view chunking requires S % nheads == 0"
    Sg = S // nheads
    sub = 16 if compute_dtype == jnp.bfloat16 else 8
    assert (Sg % sub == 0) or nheads == 1, "chunk rows must be sublane-tile aligned"

    cd = compute_dtype
    f32 = jnp.float32
    vmem_limit = _vmem_limit_bytes()

    gamma1 = params["gamma1"].reshape(1, H).astype(f32)
    beta1 = params["beta1"].reshape(1, H).astype(f32)
    gamma2 = params["gamma2"].reshape(1, H).astype(f32)
    beta2 = params["beta2"].reshape(1, H).astype(f32)
    # Cast weights once outside the kernels (halves their DMA bytes in bf16 mode).
    w_qkv = params["w_qkv"].astype(cd)      # (H, 3*NH)
    w_proj = params["w_proj"].astype(cd)    # (NH, H)
    w1 = params["w1"].astype(cd)            # (H, 4H)
    w2 = params["w2"].astype(cd)            # (4H, H)

    # --- Kernel A: LN1 + QKV, tiled over (batch, S rows, output columns) ---
    tS = _pick_tile(S, 256, sub)
    tN = _pick_tile(QKV, 512, 128)
    qkv = pl.pallas_call(
        functools.partial(ln_qkv_kernel, compute_dtype=cd),
        out_shape=jax.ShapeDtypeStruct((B, S, QKV), cd),
        grid_spec=pltpu.PrefetchScalarGridSpec(
            num_scalar_prefetch=0,
            grid=(B, S // tS, QKV // tN),
            in_specs=[
                pl.BlockSpec((1, tS, H), lambda b, i, j: (b, i, 0)),
                pl.BlockSpec((1, H), lambda b, i, j: (0, 0)),
                pl.BlockSpec((1, H), lambda b, i, j: (0, 0)),
                pl.BlockSpec((H, tN), lambda b, i, j: (0, j)),
            ],
            out_specs=pl.BlockSpec((1, tS, tN), lambda b, i, j: (b, i, j)),
        ),
        compiler_params=pltpu.CompilerParams(
            dimension_semantics=("parallel", "parallel", "parallel"),
            vmem_limit_bytes=vmem_limit),
    )(x, gamma1, beta1, w_qkv)

    # --- Kernel B: fused attention + projection + residual + LN2 + MLP ---
    out = pl.pallas_call(
        functools.partial(attn_proj_mlp_kernel, nheads=nheads, hdim=H,
                          compute_dtype=cd,
                          approx_recip=(cd != jnp.float32)),
        out_shape=jax.ShapeDtypeStruct((B, S, H), f32),
        grid_spec=pltpu.PrefetchScalarGridSpec(
            num_scalar_prefetch=0,
            grid=(B, nheads),
            in_specs=[
                pl.BlockSpec((1, Sg, QKV), lambda b, n: (b, n, 0)),   # qkv row-chunk
                pl.BlockSpec((1, Sg, H), lambda b, n: (b, n, 0)),     # x rows (residual)
                pl.BlockSpec((1, H), lambda b, n: (0, 0)),
                pl.BlockSpec((1, H), lambda b, n: (0, 0)),
                pl.BlockSpec((NH, H), lambda b, n: (0, 0)),
                pl.BlockSpec((H, 4 * H), lambda b, n: (0, 0)),
                pl.BlockSpec((4 * H, H), lambda b, n: (0, 0)),
            ],
            out_specs=pl.BlockSpec((1, Sg, H), lambda b, n: (b, n, 0)),
            scratch_shapes=[
                pltpu.VMEM((S, H), f32),     # q (blocked order)
                pltpu.VMEM((S, H), f32),     # k
                pltpu.VMEM((S, H), f32),     # v
                pltpu.VMEM((Sg, NH), f32),   # attention out, flat-view tile
            ]),
        compiler_params=pltpu.CompilerParams(
            dimension_semantics=("parallel", "parallel"),
            vmem_limit_bytes=vmem_limit),
    )(qkv, x, gamma2, beta2, w_proj, w1, w2)
    return out


# ---------------------------- pure-JAX reference --------------------------------
def att_block_ref(x, p, nheads):
    B, S, H = x.shape

    def ln(v, g, b):
        m = v.mean(-1, keepdims=True)
        var = ((v - m) ** 2).mean(-1, keepdims=True)
        return (v - m) / jnp.sqrt(var + LN_EPS) * g + b

    y = ln(x, p["gamma1"], p["beta1"])
    qkv = y @ p["w_qkv"]
    q, k, v = jnp.split(qkv, 3, axis=-1)
    # NB: this is torch's flat .view(B, nheads, S, H), not a head-split transpose.
    q = q.reshape(B, nheads, S, H)
    k = k.reshape(B, nheads, S, H)
    v = v.reshape(B, nheads, S, H)
    att = jnp.einsum("bnsh,bnth->bnst", q, k) / math.sqrt(H)
    mask = jnp.tril(jnp.ones((S, S))) == 0
    att = jnp.where(mask, -jnp.inf, att)
    att = jax.nn.softmax(att, axis=-1)
    o = jnp.einsum("bnst,bnth->bnsh", att, v).reshape(B, S, nheads * H)
    o = o @ p["w_proj"]
    z = ln(x + o, p["gamma2"], p["beta2"])
    h = z @ p["w1"]
    g = 0.5 * h * (1.0 + jnp.tanh(math.sqrt(2.0 / math.pi) * (h + 0.044715 * h ** 3)))
    return g @ p["w2"]


if __name__ == "__main__":
    B, S, H, NHEADS = 2, 32, 32, 2

    key = jax.random.PRNGKey(0)
    kx, k1, k2, k3, k4 = jax.random.split(key, 5)
    x = jax.random.normal(kx, (B, S, H), dtype=jnp.float32)

    params = {
        # SelfAttention params: torch.rand / sqrt(hdim)
        "w_qkv": jax.random.uniform(k1, (H, 3 * NHEADS * H), jnp.float32) / math.sqrt(H),
        "w_proj": jax.random.uniform(k2, (NHEADS * H, H), jnp.float32) / math.sqrt(H),
        # MLP linears (bias=False), stored pre-transposed as [in, out]
        "w1": jax.random.uniform(k3, (H, 4 * H), jnp.float32, -1.0, 1.0) / math.sqrt(H),
        "w2": jax.random.uniform(k4, (4 * H, H), jnp.float32, -1.0, 1.0) / math.sqrt(4 * H),
        # LayerNorm default init
        "gamma1": jnp.ones((H,), jnp.float32),
        "beta1": jnp.zeros((H,), jnp.float32),
        "gamma2": jnp.ones((H,), jnp.float32),
        "beta2": jnp.zeros((H,), jnp.float32),
    }

    ref = att_block_ref(x, params, NHEADS)

    # Full-precision path (tight check).
    out = att_block_forward(x, params, NHEADS, compute_dtype=jnp.float32)
    out = jax.block_until_ready(out)
    assert out.shape == (B, S, H)
    assert jnp.allclose(out, ref, rtol=1e-3, atol=1e-3), float(jnp.max(jnp.abs(out - ref)))

    # Fast path: bf16 MXU operands + bf16 qkv intermediate, f32 accumulation/elementwise.
    out_bf16 = att_block_forward(x, params, NHEADS, compute_dtype=jnp.bfloat16)
    out_bf16 = jax.block_until_ready(out_bf16)
    assert jnp.allclose(out_bf16, ref, rtol=5e-2, atol=5e-2), float(jnp.max(jnp.abs(out_bf16 - ref)))

    print("KERNEL_OK")
</pallas_src>

<mosaic_0001>
module attributes {stable_mosaic.version = 11 : i64} {
  func.func @ln_qkv_kernel(%arg0: i32, %arg1: i32, %arg2: i32, %arg3: memref<1x32x32xf32, #tpu.memory_space<vmem>>, %arg4: memref<1x32xf32, #tpu.memory_space<vmem>>, %arg5: memref<1x32xf32, #tpu.memory_space<vmem>>, %arg6: memref<32x192xf32, #tpu.memory_space<vmem>>, %arg7: memref<1x32x192xf32, #tpu.memory_space<vmem>>) attributes {dimension_semantics = [#tpu.dimension_semantics<parallel>, #tpu.dimension_semantics<parallel>, #tpu.dimension_semantics<parallel>], iteration_bounds = array<i64: 2, 1, 1>, scalar_prefetch = 0 : i64, scratch_operands = 0 : i64, tpu.core_type = #tpu.core_type<tc>, window_params = [{transform_indices = @transform_0, window_bounds = array<i64: 1, 32, 32>}, {pipeline_mode = #tpu.pipeline_mode<synchronous>, transform_indices = @transform_1, window_bounds = array<i64: 1, 32>}, {pipeline_mode = #tpu.pipeline_mode<synchronous>, transform_indices = @transform_2, window_bounds = array<i64: 1, 32>}, {transform_indices = @transform_3, window_bounds = array<i64: 32, 192>}, {transform_indices = @transform_4, window_bounds = array<i64: 1, 32, 192>}]} {
    %c0 = arith.constant 0 : index
    %c0_0 = arith.constant 0 : index
    %c0_1 = arith.constant 0 : index
    %0 = vector.load %arg3[%c0, %c0_0, %c0_1] : memref<1x32x32xf32, #tpu.memory_space<vmem>>, vector<1x32x32xf32>
    %1 = vector.shape_cast %0 : vector<1x32x32xf32> to vector<32x32xf32>
    %c0_2 = arith.constant 0 : index
    %c0_3 = arith.constant 0 : index
    %2 = vector.load %arg4[%c0_2, %c0_3] : memref<1x32xf32, #tpu.memory_space<vmem>>, vector<1x32xf32>
    %c0_4 = arith.constant 0 : index
    %c0_5 = arith.constant 0 : index
    %3 = vector.load %arg5[%c0_4, %c0_5] : memref<1x32xf32, #tpu.memory_space<vmem>>, vector<1x32xf32>
    %cst = arith.constant dense<0.000000e+00> : vector<32xf32>
    %4 = vector.multi_reduction <add>, %1, %cst [1] : vector<32x32xf32> to vector<32xf32>
    %5 = vector.shape_cast %4 : vector<32xf32> to vector<32x1xf32>
    %cst_6 = arith.constant 3.200000e+01 : f32
    %6 = vector.broadcast %cst_6 : f32 to vector<32x1xf32>
    %7 = arith.divf %5, %6 : vector<32x1xf32>
    %8 = vector.broadcast %7 : vector<32x1xf32> to vector<32x32xf32>
    %9 = arith.subf %1, %8 : vector<32x32xf32>
    %10 = arith.mulf %9, %9 : vector<32x32xf32>
    %cst_7 = arith.constant dense<0.000000e+00> : vector<32xf32>
    %11 = vector.multi_reduction <add>, %10, %cst_7 [1] : vector<32x32xf32> to vector<32xf32>
    %12 = vector.shape_cast %11 : vector<32xf32> to vector<32x1xf32>
    %cst_8 = arith.constant 3.200000e+01 : f32
    %13 = vector.broadcast %cst_8 : f32 to vector<32x1xf32>
    %14 = arith.divf %12, %13 : vector<32x1xf32>
    %15 = vector.broadcast %7 : vector<32x1xf32> to vector<32x32xf32>
    %16 = arith.subf %1, %15 : vector<32x32xf32>
    %cst_9 = arith.constant 9.99999974E-6 : f32
    %17 = vector.broadcast %cst_9 : f32 to vector<32x1xf32>
    %18 = arith.addf %14, %17 : vector<32x1xf32>
    %19 = math.rsqrt %18 : vector<32x1xf32>
    %20 = vector.broadcast %19 : vector<32x1xf32> to vector<32x32xf32>
    %21 = arith.mulf %16, %20 : vector<32x32xf32>
    %22 = vector.broadcast %2 : vector<1x32xf32> to vector<32x32xf32>
    %23 = arith.mulf %21, %22 : vector<32x32xf32>
    %24 = vector.broadcast %3 : vector<1x32xf32> to vector<32x32xf32>
    %25 = arith.addf %23, %24 : vector<32x32xf32>
    %c0_10 = arith.constant 0 : index
    %c0_11 = arith.constant 0 : index
    %26 = vector.load %arg6[%c0_10, %c0_11] : memref<32x192xf32, #tpu.memory_space<vmem>>, vector<32x192xf32>
    %cst_12 = arith.constant dense<0.000000e+00> : vector<32x192xf32>
    %27 = tpu.matmul %25, %26, %cst_12 {dimension_numbers = #tpu.dot_dimension_numbers<[1], [0], [0], [1], [0, 0, 1, 1], [], []>} : vector<32x32xf32>, vector<32x192xf32>, vector<32x192xf32> -> vector<32x192xf32>
    %c0_13 = arith.constant 0 : index
    %c0_14 = arith.constant 0 : index
    %c0_15 = arith.constant 0 : index
    %28 = vector.load %arg7[%c0_13, %c0_14, %c0_15] : memref<1x32x192xf32, #tpu.memory_space<vmem>>, vector<1x32x192xf32>
    %29 = vector.shape_cast %28 : vector<1x32x192xf32> to vector<32x192xf32>
    %30 = vector.shape_cast %27 : vector<32x192xf32> to vector<1x32x192xf32>
    tpu.vector_store %arg7[%c0_13, %c0_14, %c0_15], %30 {strides = array<i32>} : memref<1x32x192xf32, #tpu.memory_space<vmem>>, vector<1x32x192xf32>,
    return
  }
  func.func @transform_0(%arg0: i32, %arg1: i32, %arg2: i32) -> (i32, i32, i32) {
    %c0_i32 = arith.constant 0 : i32
    %c0_i32_0 = arith.constant 0 : i32
    return %arg0, %arg1, %c0_i32 : i32, i32, i32
  }
  func.func @transform_1(%arg0: i32, %arg1: i32, %arg2: i32) -> (i32, i32) {
    %c0_i32 = arith.constant 0 : i32
    %c0_i32_0 = arith.constant 0 : i32
    %c0_i32_1 = arith.constant 0 : i32
    return %c0_i32, %c0_i32_0 : i32, i32
  }
  func.func @transform_2(%arg0: i32, %arg1: i32, %arg2: i32) -> (i32, i32) {
    %c0_i32 = arith.constant 0 : i32
    %c0_i32_0 = arith.constant 0 : i32
    %c0_i32_1 = arith.constant 0 : i32
    return %c0_i32, %c0_i32_0 : i32, i32
  }
  func.func @transform_3(%arg0: i32, %arg1: i32, %arg2: i32) -> (i32, i32) {
    %c0_i32 = arith.constant 0 : i32
    %c0_i32_0 = arith.constant 0 : i32
    return %c0_i32, %arg2 : i32, i32
  }
  func.func @transform_4(%arg0: i32, %arg1: i32, %arg2: i32) -> (i32, i32, i32) {
    %c0_i32 = arith.constant 0 : i32
    return %arg0, %arg1, %arg2 : i32, i32, i32
  }
}

</mosaic_0001>

<bundles_post_ra>
// kernel: tpu_custom_call.1
= control target key start
LH: loop header
LB: loop body
LE: loop exit
PB: predicated region body
PF: predicated region fallthrough
CT: control target
= control target key end

     0   :  { %s1111_s0 = inlined_call_operand.hbm [shape: f32[2,32,32], index: 0, kind: input, shape index: {}]   ;;  %s1112_s1 = inlined_call_operand.vmem [shape: f32[1,32], index: 1, kind: input, shape index: {}]   ;;  %s1113_s2 = inlined_call_operand.vmem [shape: f32[1,32], index: 2, kind: input, shape index: {}]   ;;  %s1114_s3 = inlined_call_operand.hbm [shape: f32[32,192], index: 3, kind: input, shape index: {}]   ;;  %s1115_s4 = inlined_call_operand.hbm [shape: f32[2,32,192], index: 4, kind: output, shape index: {}]  }
   0x1   :  { %1117 = sst [smem:[#allocation11_spill]] %s1114_s3 }
   0x2   :  { %9 = vsyncpa [#allocation3], 0 }
   0x3   :  { %11 = vsyncpa [#allocation3 + $0x1], 0 }
   0x4   :  { %12 = vsyncpa [#allocation6], 0 }
   0x5   :  { %13 = vsyncpa [#allocation4], 0 }
   0x6   :  { %15 = vsyncpa [#allocation4 + $0x1], 0  ;;  %s887_s15 = smov 0   ;;  %s889_s16 = smov 0  }
   0x7   :  { %s891_s17 = smov 0   ;;  %s893_s18 = smov 0  }
   0x8   :  { %s895_s19 = smov 0   ;;  %s897_s20 = smov 0  }
   0x9 LB: > { %s591_s21 = sadd.s32 4294967295, %s850_s20   ;;  %s592_s22 = sadd.s32 4294967294, %s850_s20   ;;  %s850_s20 = sphi %s897_s20, %s21_s20   ;;  %s846_s19 = sphi %s895_s19, %s1135_s19   ;;  %s842_s18 = sphi %s893_s18, %s1134_s18   ;;  %s838_s17 = sphi %s891_s17, %s1133_s17   ;;  %s834_s16 = sphi %s889_s16, %s1132_s16   ;;  %s830_s15 = sphi %s887_s15, %s1131_s15  }
   0xa   : > { %p62_p0 = scmp.ne.s32.totalorder %s834_s16, %s830_s15  ;;  %p921_p1 = scmp.eq.s32.totalorder %s591_s21, 0 }
   0xb   : > { %p925_p2 = scmp.eq.s32.totalorder %s591_s21, 1  ;;  %p164_p3 = scmp.eq.s32.totalorder %s592_s22, 1 }
   0xc   : > { %p931_p4 = por %p921_p1, %p62_p0  ;;  %p593_p5 = scmp.ge.s32.totalorder %s850_s20, 1 }
   0xd   : > { %p936_p6 = por %p164_p3, %p62_p0  ;;  %p171_p7 = scmp.lt.s32.totalorder %s850_s20, 3 }
   0xe   : > { %s1120_s25 = scalar_select %p931_p4, 1, 0 }
   0xf   : > { %s1121_s26 = scalar_select %p936_p6, 1, 0 }
  0x10   : > { %p941_p8 = pnand %p593_p5, %p171_p7  ;;  %s852_s28 = smov [#allocation5]  }
  0x11   : > { %s192_s29 = sshll.u32 %s852_s28, 4  ;;  %s40_s5 = sadd.s32 1, %s846_s19  ;;  %s193_s29 = int_to_ptr.vmem [resolvable:$true] %s192_s29 }
  0x12   : > { %p632_p9 = pneg %p941_p8  ;;  %s723_s6 = scalar_lea.vmem %s193_s29, 1024 }
  0x13   : > { %p724_p13 = scmp.ne.s32.totalorder %s193_s29, %s723_s6  ;;  %p731_p5 = scmp.lt.s32.totalorder %s193_s29, %s193_s29 }
  0x14   : > { %p950_p11 = pnand %p632_p9, %p921_p1  ;;  %p732_p7 = scmp.lt.s32.totalorder %s723_s6, %s723_s6 }
  0x16   : > { %p714_p12 = pneg %p950_p11  ;;  %p733_p6 = por %p732_p7, %p731_p5 }
  0x18   : > { %p726_p0 = pnand %p724_p13, %p714_p12 }
  0x1a   : > { %p727_p3 = pneg %p726_p0 }
  0x1c   : > { %p734_p4 = pnand %p733_p6, %p727_p3 }
  0x1e   : > { %737 = shalt.err (!%p734_p4)
}
  0x1f   : > { %s853_s7 = smov 256   ;;  %s854_s8 = smov 16  }
  0x20   : > { %s1124_s3 = sld [smem:[#allocation11_spill]]  ;;  %p42_p6 = scmp.ge.s32.totalorder %s40_s5, 2 }
  0x21   : > { %s49_s11 = sadd.s32 1, %s838_s17  ;;  %p56_p4 = scmp.ne.s32.totalorder %s838_s17, %s834_s16 }
  0x22   : > { %p57_p9 = scmp.eq.s32.totalorder %s850_s20, 0  ;;  %s1137_s5 = smov (%p42_p6, %s40_s5), 0 }
  0x23   : > { %p974_p13 = por %p925_p2, %p56_p4  ;;  %s44_s14 = ssub.s32 %s846_s19, %s1137_s5 }
  0x24   : > { %p968_p12 = por %p57_p9, %p56_p4  ;;  %p645_p0 = scmp.lt.s32.totalorder %s850_s20, 2 }
  0x25   : > { %s206_s21 = sand.u32 1, %s838_s17  }
  0x26   : > { %635 = dma.hbm_to_vmem [thread:$0]  (!%p950_p11), %s1124_s3, 1024, %s193_s29, [#allocation6], %s853_s7, %s853_s7, %s854_s8  }
  0x27   : > { %p47_p11 = scmp.eq.s32.totalorder %s44_s14, 0  ;;  %s596_s22 = sshll.u32 %s206_s21, 5 }
  0x28   : > { %s614_s29 = sshll.u32 %s846_s19, 9  ;;  %s210_s8 = scalar_lea.vmem [#allocation2], %s596_s22 }
  0x29   : > { %s983_s28 = scalar_select %p47_p11, %s838_s17, %s49_s11  }
  0x2a   : > { %s218_s7 = scalar_lea.hbm %s1111_s0, %s614_s29  ;;  %s219_s9 = sshll.u32 %s210_s8, 4  ;;  %s220_s9 = int_to_ptr.vmem [resolvable:$true] %s219_s9 }
  0x2b   : > { %p991_p2 = pnand %p645_p0, %p968_p12  ;;  %s207_s10 = scalar_lea.sflag [#allocation3], %s206_s21 }
  0x2c   : > { %s751_s14 = scalar_lea.vmem %s220_s9, 512  ;;  %s855_s11 = smov [#allocation2]  }
  0x2d   : > { %p740_p3 = pneg %p991_p2  ;;  %p752_p5 = scmp.ne.s32.totalorder %s220_s9, %s751_s14 }
  0x2e   : > { %s756_s3 = sshll.u32 %s855_s11, 4  ;;  %s757_s3 = int_to_ptr.vmem [resolvable:$false] %s756_s3 }
  0x2f   : > { %p754_p7 = pnand %p752_p5, %p740_p3  ;;  %s758_s29 = scalar_lea.vmem %s757_s3, 1024 }
  0x30   : > { %p759_p4 = scmp.lt.s32.totalorder %s220_s9, %s757_s3  ;;  %p760_p9 = scmp.lt.s32.totalorder %s758_s29, %s751_s14 }
  0x31   : > { %p755_p6 = pneg %p754_p7 }
  0x32   : > { %p761_p11 = por %p760_p9, %p759_p4 }
  0x34   : > { %p762_p10 = pnand %p761_p11, %p755_p6 }
  0x36   : > { %765 = shalt.err (!%p762_p10)
}
  0x37   : > { %s856_s12 = smov 128   ;;  %s857_s22 = smov 8  }
  0x38   : > { %639 = dma.hbm_to_vmem [thread:$0]  (!%p991_p2), %s218_s7, 512, %s220_s9, %s207_s10, %s856_s12, %s856_s12, %s857_s22  }
  0x39   : > { %231 = sbr.rel (%p941_p8) target bundleno = 591 (0x24f), region = 36  ;;  %s1002_s21 = sand.u32 (!%p941_p8), 1, %s834_s16  }
  0x3a   : > { %s600_s30 = sshll.u32 (!%p941_p8), %s1002_s21, 5  ;;  %s234_s3 = scalar_lea.sflag (!%p941_p8), [#allocation3], %s1002_s21 }
  0x3b   : > { %s237_s6 = scalar_lea.vmem (!%p941_p8), [#allocation2], %s600_s30  ;;  %p1128_p12 = scmp.ne.s32.totalorder (!%p941_p8), %s1120_s25, 0 }
  0x3e   : > { %817 = dma.done.wait (%p1128_p12), %s234_s3, 512  }
  0x3f   : > { %819 = vsyncadd (%p1128_p12), %s234_s3, 4294966784 }
  0x40   : > { %821 = dma.done.wait (%p921_p1), [#allocation6], 1024  }
  0x41   : > { %823 = vsyncadd (%p921_p1), [#allocation6], 4294966272  ;;  %vm276_vm0 = vcmask 261120   ;;  %v270_v0 = vld [vmem:[%s237_s6] sm:$0xff]  ;;  %v271_v1 = vld [vmem:[%s237_s6 + $0x8] sm:$0xff]  ;;  %v858_v36 = vmov 0.0  }
  0x42   : > { %v272_v2 = vld [vmem:[%s237_s6 + $0x10] sm:$0xff]  ;;  %v277_v3 = vsel %vm276_vm0, %v270_v0, 0.0  ;;  %v280_v4 = vsel %vm276_vm0, %v271_v1, 0.0  ;;  %v273_v5 = vld [vmem:[%s237_s6 + $0x18] sm:$0xff]  ;;  %v355_v30 = vld [vmem:[#allocation5 + $0x28] sm:$0xff]  ;;  %434 = vmatprep.mubr.f32.mxu0 %v858_v36  ;;  %446 = vmatprep.mubr.f32.mxu1 %v858_v36  ;;  %s602_s8 = sshll.u32 %s1002_s21, 6 }
  0x43   : > { %278 = vadd.xlane.f32.xlu0 %v277_v3  ;;  %281 = vadd.xlane.f32.xlu1 %v280_v4  ;;  %v283_v6 = vsel %vm276_vm0, %v272_v2, 0.0  ;;  %v286_v7 = vsel %vm276_vm0, %v273_v5, 0.0  ;;  %v357_v28 = vld [vmem:[#allocation5 + $0x38] sm:$0xff]  ;;  %v356_v29 = vld [vmem:[#allocation5 + $0x30] sm:$0xff]  ;;  %v354_v31 = vld [vmem:[#allocation5 + $0x20] sm:$0xff]  ;;  %vm460_vm1 = vcmask 523264  }
  0x44   : > { %394 = vmatprep.subr.mxu0 %v357_v28  ;;  %616 = vmatprep.subr.mxu1 %v357_v28  ;;  %v353_v32 = vld [vmem:[#allocation5 + $0x18] sm:$0xff]  ;;  %v352_v33 = vld [vmem:[#allocation5 + $0x10] sm:$0xff]  ;;  %v351_v34 = vld [vmem:[#allocation5 + $0x8] sm:$0xff]  ;;  %s265_s9 = scalar_lea.vmem [#allocation7], %s602_s8  ;;  %s615_s10 = sshll.u32 %s842_s18, 10 }
  0x45   : > { %395 = vmatpush1.msra.mxu0 %v356_v29  ;;  %620 = vmatpush1.msra.mxu1 %v356_v29  ;;  %v350_v35 = vld [vmem:[#allocation5] sm:$0xff]  ;;  %s487_s24 = sshll.u32 %s265_s9, 4  ;;  %s1062_s29 = scalar_lea.hbm %s1115_s4, %s615_s10  ;;  %s1055_s24 = int_to_ptr.vmem [resolvable:$true] %s487_s24 }
  0x46   : > { %396 = vmatprep.subr.mxu0 %v355_v30  ;;  %617 = vmatprep.subr.mxu1 %v355_v30  ;;  %v603_v50 = vld [vmem:[%s1112_s1] ss:$0 sm:$0xff]  ;;  %s469_s18 = scalar_lea.sflag [#allocation4], %s1002_s21  ;;  %s766_s12 = scalar_lea.vmem %s1055_s24, 1024 }
  0x47   : > { %284 = vadd.xlane.f32.xlu0 %v283_v6  ;;  %287 = vadd.xlane.f32.xlu1 %v286_v7  ;;  %v604_v52 = vld [vmem:[%s1113_s2] ss:$0 sm:$0xff]  ;;  %p767_p1 = scmp.ne.s32.totalorder %s1055_s24, %s766_s12  ;;  %s859_s22 = smov [#allocation7]  }
  0x48   : > { %397 = vmatpush1.msra.mxu0 %v354_v31  ;;  %621 = vmatpush1.msra.mxu1 %v354_v31  ;;  %s770_s30 = sshll.u32 %s859_s22, 4  ;;  %s771_s30 = int_to_ptr.vmem [resolvable:$false] %s770_s30 }
  0x49   : > { %398 = vmatprep.subr.mxu0 %v353_v32  ;;  %618 = vmatprep.subr.mxu1 %v353_v32  ;;  %p768_p8 = pnand %p767_p1, %p974_p13  ;;  %s772_s3 = scalar_lea.vmem %s771_s30, 2048 }
  0x4a   : > { %399 = vmatpush1.msra.mxu0 %v352_v33  ;;  %622 = vmatpush1.msra.mxu1 %v352_v33  ;;  %p773_p0 = scmp.lt.s32.totalorder %s1055_s24, %s771_s30  ;;  %p774_p2 = scmp.lt.s32.totalorder %s772_s3, %s766_s12 }
  0x4b   : > { %400 = vmatprep.subr.mxu0 %v351_v34  ;;  %619 = vmatprep.subr.mxu1 %v351_v34  ;;  %p769_p10 = pneg %p768_p8 }
  0x4c   : > { %401 = vmatpush1.msra.mxu0 %v350_v35  ;;  %623 = vmatpush1.msra.mxu1 %v350_v35  ;;  %p775_p3 = por %p774_p2, %p773_p0 }
  0x4e   : > { %p776_p5 = pnand %p775_p3, %p769_p10 }
  0xcc   : > { %v279_v8 = vpop.xlane.xlu0 %278  ;;  %v282_v9 = vpop.xlane.xlu1 %281 }
  0xcd   : > { %v290_v10 = vmul.f32 0.03125, %v279_v8  ;;  %v291_v11 = vmul.f32 0.03125, %v282_v9 }
  0xcf   : > { %v1018_v12 = vsub.f32 %v270_v0, %v290_v10  ;;  %v1020_v13 = vsub.f32 %v271_v1, %v291_v11 }
  0xd0   : > { %v285_v14 = vpop.xlane.xlu0 %284  ;;  %v288_v15 = vpop.xlane.xlu1 %287 }
  0xd1   : > { %v292_v16 = vmul.f32 0.03125, %v285_v14  ;;  %v293_v17 = vmul.f32 0.03125, %v288_v15  ;;  %v298_v18 = vmul.f32 %v1018_v12, %v1018_v12  ;;  %v299_v19 = vmul.f32 %v1020_v13, %v1020_v13 }
  0xd3   : > { %v1026_v20 = vsub.f32 %v272_v2, %v292_v16  ;;  %v1028_v21 = vsub.f32 %v273_v5, %v293_v17  ;;  %v302_v22 = vsel %vm276_vm0, %v298_v18, 0.0  ;;  %v305_v23 = vsel %vm276_vm0, %v299_v19, 0.0 }
  0xd4   : > { %303 = vadd.xlane.f32.xlu0 %v302_v22 }
  0xd5   : > { %v300_v24 = vmul.f32 %v1026_v20, %v1026_v20  ;;  %v301_v25 = vmul.f32 %v1028_v21, %v1028_v21 }
  0xd7   : > { %v308_v26 = vsel %vm276_vm0, %v300_v24, 0.0  ;;  %v311_v27 = vsel %vm276_vm0, %v301_v25, 0.0 }
  0xd8   : > { %306 = vadd.xlane.f32.xlu0 %v305_v23  ;;  %309 = vadd.xlane.f32.xlu1 %v308_v26 }
  0xdc   : > { %312 = vadd.xlane.f32.xlu1 %v311_v27 }
 0x15d   : > { %v304_v37 = vpop.xlane.xlu0 %303 }
 0x15e   : > { %v314_v38 = vmul.f32 0.03125, %v304_v37 }
 0x160   : > { %v318_v39 = vadd.f32 1e-05, %v314_v38 }
 0x161   : > { %v310_v40 = vpop.xlane.xlu1 %309  ;;  %v307_v41 = vpop.xlane.xlu0 %306 }
 0x162   : > { %704 = vrsqrt.f32 %v318_v39  ;;  %v316_v42 = vmul.f32 0.03125, %v310_v40  ;;  %v315_v43 = vmul.f32 0.03125, %v307_v41 }
 0x164   : > { %v320_v44 = vadd.f32 1e-05, %v316_v42  ;;  %v319_v45 = vadd.f32 1e-05, %v315_v43 }
 0x165   : > { %v313_v46 = vpop.xlane.xlu1 %312 }
 0x166   : > { %706 = vrsqrt.f32 %v320_v44  ;;  %v317_v47 = vmul.f32 0.03125, %v313_v46 }
 0x167   : > { %708 = vrsqrt.f32 %v319_v45 }
 0x168   : > { %v321_v48 = vadd.f32 1e-05, %v317_v47 }
 0x16a   : > { %710 = vrsqrt.f32 %v321_v48 }
 0x16f   : > { %v705_v49 = vpop.eup %704 }
 0x170   : > { %v326_v51 = vmul.f32 %v705_v49, %v1018_v12 }
 0x172   : > { %v336_v53 = vmul.f32 %v603_v50, %v326_v51 }
 0x173   : > { %v707_v54 = vpop.eup %706 }
 0x174   : > { %v709_v55 = vpop.eup %708  ;;  %v346_v56 = vadd.f32 %v604_v52, %v336_v53  ;;  %v328_v57 = vmul.f32 %v707_v54, %v1026_v20 }
 0x175   : > { %v327_v58 = vmul.f32 %v709_v55, %v1020_v13 }
 0x176   : > { %605 = vmatmul.mubr.msk.f32.vlgmr.msra.gmra.mxu0 %vm276_vm0, %v346_v56  ;;  %v338_v59 = vmul.f32 %v603_v50, %v328_v57 }
 0x177   : > { %v711_v60 = vpop.eup %710  ;;  %440 = vmatprep.mubr.f32.mxu0 %v858_v36  ;;  %v337_v61 = vmul.f32 %v603_v50, %v327_v58 }
 0x178   : > { %v348_v62 = vadd.f32 %v604_v52, %v338_v59  ;;  %v329_v63 = vmul.f32 %v711_v60, %v1028_v21 }
 0x179   : > { %v347_v0 = vadd.f32 %v604_v52, %v337_v61 }
 0x17a   : > { %607 = vmatmul.mubr.msk.f32.vlgmr.msra.gmra.mxu1 %vm276_vm0, %v348_v62  ;;  %v339_v1 = vmul.f32 %v603_v50, %v329_v63 }
 0x17b   : > { %606 = vmatmul.mubr.msk.f32.gmra.mxu0 %vm276_vm0, %v347_v0  ;;  %452 = vmatprep.mubr.f32.mxu1 %v858_v36 }
 0x17c   : > { %v349_v2 = vadd.f32 %v604_v52, %v339_v1 }
 0x17e   : > { %608 = vmatmul.mubr.msk.f32.gmra.mxu1 %vm276_vm0, %v349_v2 }
 0x236   : > { %v436_v3 = vpop.f32.mrf.mxu0 }
 0x237   : > { %459 = vst [vmem:[%s265_s9] sm:$0xff] %v436_v3 }
 0x238   : > { %v438_v4 = vpop.f32.mrf.mxu0 }
 0x239   : > { %461 = vst.msk [vmem:[%s265_s9 + $0x8] sm:$0xff] %vm460_vm1, %v438_v4 }
 0x23a   : > { %v448_v5 = vpop.f32.mrf.mxu1 }
 0x23b   : > { %v442_v6 = vpop.f32.mrf.mxu0  ;;  %464 = vst [vmem:[%s265_s9 + $0x20] sm:$0xff] %v448_v5 }
 0x23c   : > { %462 = vst [vmem:[%s265_s9 + $0x10] sm:$0xff] %v442_v6  ;;  %v450_v7 = vpop.f32.mrf.mxu1 }
 0x23d   : > { %v444_v8 = vpop.f32.mrf.mxu0  ;;  %465 = vst.msk [vmem:[%s265_s9 + $0x28] sm:$0xff] %vm460_vm1, %v450_v7 }
 0x23e   : > { %463 = vst.msk [vmem:[%s265_s9 + $0x18] sm:$0xff] %vm460_vm1, %v444_v8  ;;  %v454_v9 = vpop.f32.mrf.mxu1 }
 0x23f   : > { %466 = vst [vmem:[%s265_s9 + $0x30] sm:$0xff] %v454_v9 }
 0x240   : > { %v456_v10 = vpop.f32.mrf.mxu1 }
 0x241   : > { %467 = vst.msk [vmem:[%s265_s9 + $0x38] sm:$0xff] %vm460_vm1, %v456_v10 }
 0x242   : > { %779 = shalt.err (!%p776_p5)
}
 0x243   : > { %s780_s6 = scalar_lea.hbm %s1062_s29, 1024  ;;  %s784_s27 = scalar_lea.hbm %s1115_s4, 2048 }
 0x244   : > { %p781_p7 = scmp.ne.s32.totalorder %s1062_s29, %s780_s6  ;;  %p785_p9 = scmp.lt.s32.totalorder %s1062_s29, %s1115_s4 }
 0x245   : > { %p786_p11 = scmp.lt.s32.totalorder %s784_s27, %s780_s6 }
 0x246   : > { %p782_p6 = pnand %p781_p7, %p974_p13 }
 0x247   : > { %p787_p12 = por %p786_p11, %p785_p9 }
 0x248   : > { %p783_p4 = pneg %p782_p6 }
 0x24a   : > { %p788_p1 = pnand %p787_p12, %p783_p4 }
 0x24c   : > { %791 = shalt.err (!%p788_p1)
}
 0x24d   : > { %s860_s9 = smov 256   ;;  %s861_s10 = smov 16  }
 0x24e   : > { %630 = dma.vmem_to_hbm [thread:$0]  (%p974_p13), %s1055_s24, 1024, %s1062_s29, %s469_s18, %s860_s9, %s860_s9, %s861_s10  }
 0x24f PF: > { %s502_s14 = sand.u32 1, %s830_s15   ;;  %p1129_p8 = scmp.ne.s32.totalorder %s1121_s26, 0 }
 0x250   : > { %p1130_p10 = scmp.ge.s32.totalorder %s850_s20, 2  ;;  %s503_s11 = scalar_lea.sflag [#allocation4], %s502_s14 }
 0x252   : > { %p641_p0 = pnand %p1130_p10, %p1129_p8 }
 0x254   : > { %p642_p2 = pneg %p641_p0 }
 0x256   : > { %825 = dma.done.wait (%p642_p2), %s503_s11, 1024  }
 0x257   : > { %827 = vsyncadd (%p642_p2), %s503_s11, 4294966272  ;;  %s21_s20 = sadd.s32 1, %s850_s20   ;;  %s1131_s15 = smov %s834_s16 }
 0x258   : > { %p18_p3 = scmp.ge.s32.totalorder %s21_s20, 4   ;;  %s1132_s16 = smov %s838_s17 }
 0x259   : > { %s1133_s17 = smov %s983_s28  ;;  %s1134_s18 = smov %s846_s19 }
 0x25a   : > { %s1135_s19 = smov %s1137_s5  ;;  %20 = sbr.rel (!%p18_p3) target bundleno = 9 (0x9), region = 86 }
 0x25f   :  { %508 = vsyncpa [#allocation3], 1 }
 0x260   :  { %510 = vsyncpa [#allocation3 + $0x1], 1 }
 0x261   :  { %511 = vsyncpa [#allocation6], 1 }
 0x262   :  { %512 = vsyncpa [#allocation4], 1 }
 0x263   :  { %514 = vsyncpa [#allocation4 + $0x1], 1 }

</bundles_post_ra>
